<compile_context>
chip_gen: v7x
topology: tpu7x:2x2x1
jax: 0.10.0
libtpu: 0.0.40
codegen_flags: <defaults>
</compile_context>

<pallas_src>
import random
import string
import sys
from functools import lru_cache

import jax
import jax.numpy as jnp
import numpy as np
from jax import lax
from jax.experimental import pallas as pl
from jax.experimental.pallas import tpu as pltpu

ALPHABET = string.ascii_uppercase + string.digits  # 36 symbols
LANE = 128
SUBLANE = 8
CHARS_PER_WORD = 4          # 4 ASCII bytes packed per uint32 output word
MAX_TILE_W = 2048           # uint32 words per block column -> 64 KiB per (8, 2048) block


def _fmix32(h):
    """murmur3 finalizer: uint32 -> well-mixed uint32 (pure VPU int ops)."""
    h = h ^ (h >> 16)
    h = h * jnp.uint32(0x85EBCA6B)
    h = h ^ (h >> 13)
    h = h * jnp.uint32(0xC2B2AE35)
    h = h ^ (h >> 16)
    return h


def _char_code(half16):
    """Map a uniform 16-bit value to the ASCII code of an A-Z / 0-9 char.

    Exact integer mul-high: idx = (half * 36) >> 16  (no fp rounding hazard,
    no minimum guard, no dtype converts).
    """
    idx = (half16 * jnp.uint32(36)) >> 16
    # idx <  26 -> 'A' + idx        (65 + idx)
    # idx >= 26 -> '0' + (idx - 26) (22 + idx)
    return idx + jnp.where(idx < 26, jnp.uint32(65), jnp.uint32(22))


def _rand_string_kernel(seed_ref, out_ref):
    """Fill one (SUBLANE, TILE_W) uint32 block with 4-char-packed random ASCII."""
    shape = out_ref.shape
    block_words = shape[0] * shape[1]

    # Per-block word counter: local iota + scalar block offset.
    base = pl.program_id(0) * block_words
    rows = lax.broadcasted_iota(jnp.int32, shape, 0)
    cols = lax.broadcasted_iota(jnp.int32, shape, 1)
    lin = (rows * shape[1] + cols + base).astype(jnp.uint32)

    # Seed mixing once per block on the scalar path.
    seed_u = seed_ref[0].astype(jnp.uint32) * jnp.uint32(0x9E3779B9)

    # Two counter-based hashes per 4-char word; each hash yields two chars
    # from its 16-bit halves (amortizes the fmix32 chain over 2 characters).
    ctr = seed_u + (lin << 1)
    h0 = _fmix32(ctr)
    h1 = _fmix32(ctr + jnp.uint32(1))

    c0 = _char_code(h0 & jnp.uint32(0xFFFF))
    c1 = _char_code(h0 >> 16)
    c2 = _char_code(h1 & jnp.uint32(0xFFFF))
    c3 = _char_code(h1 >> 16)

    # Pack 4 ASCII bytes per uint32 (little-endian byte order): 1 output byte
    # per character for both HBM writeback and the D2H copy.
    out_ref[...] = c0 | (c1 << 8) | (c2 << 16) | (c3 << 24)


@lru_cache(maxsize=None)
def _build_generator(nblocks, tile_w):
    """Cached, jitted pallas_call for a given (nblocks, tile_w) bucket."""
    call = pl.pallas_call(
        _rand_string_kernel,
        out_shape=jax.ShapeDtypeStruct((SUBLANE, nblocks * tile_w), jnp.uint32),
        grid_spec=pltpu.PrefetchScalarGridSpec(
            num_scalar_prefetch=1,          # seed lives in SMEM
            grid=(nblocks,),
            in_specs=[],
            out_specs=pl.BlockSpec((SUBLANE, tile_w), lambda i, seed: (0, i)),
        ),
        compiler_params=pltpu.CompilerParams(
            dimension_semantics=("parallel",)),  # v7x: shard blocks over both TCs
    )
    return jax.jit(call)


def _round_up(x, m):
    return -(-x // m) * m


def random_string_codes(length, seed):
    """Run the kernel: returns an (8, W) uint32 device array of packed codes."""
    words = -(-length // CHARS_PER_WORD)
    tile_w = min(MAX_TILE_W, max(LANE, _round_up(-(-words // SUBLANE), LANE)))
    nblocks = max(1, -(-words // (SUBLANE * tile_w)))
    seed_arr = jnp.asarray([seed], dtype=jnp.int32)
    return _build_generator(nblocks, tile_w)(seed_arr)


def random_string_generator(x, length, seed=None):
    """Pallas equivalent of RandomStringGenerator(length)(x).

    The reference forward ignores its tensor input, so `x` is kept only for
    signature fidelity and is NOT passed into the kernel.
    """
    del x  # intentionally unused, matching the reference module
    if length <= 0:
        return ""
    if seed is None:
        # Fresh randomness per call, mirroring random.choices' behavior.
        seed = random.getrandbits(31)

    codes = random_string_codes(length, seed)
    # Single bulk D2H transfer (np.asarray blocks on the result).
    arr = np.asarray(codes).reshape(-1)
    if sys.byteorder != "little":  # defensive; TPU hosts are little-endian
        arr = arr.byteswap()
    # TODO(synk): Python string assembly / host RNG semantics have no on-device equivalent.
    return arr.tobytes()[:length].decode("ascii")


if __name__ == "__main__":
    key = jax.random.PRNGKey(0)
    # NCHW input, ignored by the module's forward (kept for signature fidelity).
    x = jax.random.normal(key, (2, 4, 16, 16), dtype=jnp.float32)

    length = 8
    # Run the kernel once and block on the device result explicitly.
    codes = jax.block_until_ready(random_string_codes(length, seed=0))
    assert codes.shape == (SUBLANE, LANE) and codes.dtype == jnp.uint32

    result = random_string_generator(x, length, seed=0)
    assert isinstance(result, str)
    assert len(result) == length
    assert all(c in ALPHABET for c in result), result

    # Exercise the multi-block (grid > 1) path as well.
    long_result = random_string_generator(x, 100_000, seed=123)
    assert len(long_result) == 100_000
    assert set(long_result) <= set(ALPHABET)

    print("KERNEL_OK")
</pallas_src>

<mosaic_0001>
module attributes {stable_mosaic.version = 11 : i64} {
  func.func @_rand_string_kernel(%arg0: i32, %arg1: memref<1xi32, #tpu.memory_space<smem>>, %arg2: memref<8x128xi32, #tpu.memory_space<vmem>>) attributes {dimension_semantics = [#tpu.dimension_semantics<parallel>], iteration_bounds = array<i64: 1>, scalar_prefetch = 1 : i64, scratch_operands = 0 : i64, tpu.core_type = #tpu.core_type<tc>, window_params = [{transform_indices = @transform_0, window_bounds = array<i64: 8, 128>}]} {
    %c1024_i32 = arith.constant 1024 : i32
    %0 = arith.muli %arg0, %c1024_i32 : i32
    %1 = tpu.iota {dimensions = array<i32: 0>} : vector<8x128xi32>
    %2 = tpu.iota {dimensions = array<i32: 1>} : vector<8x128xi32>
    %c128_i32 = arith.constant 128 : i32
    %3 = vector.broadcast %c128_i32 : i32 to vector<8x128xi32>
    %4 = arith.muli %1, %3 : vector<8x128xi32>
    %5 = arith.addi %4, %2 : vector<8x128xi32>
    %6 = vector.broadcast %0 : i32 to vector<8x128xi32>
    %7 = arith.addi %5, %6 : vector<8x128xi32>
    %c0 = arith.constant 0 : index
    %8 = memref.load %arg1[%c0] : memref<1xi32, #tpu.memory_space<smem>>
    %c-1640531527_i32 = arith.constant -1640531527 : i32
    %9 = arith.muli %8, %c-1640531527_i32 : i32
    %c1_i32 = arith.constant 1 : i32
    %10 = vector.broadcast %c1_i32 : i32 to vector<8x128xi32>
    %11 = arith.shli %7, %10 : vector<8x128xi32>
    %12 = vector.broadcast %9 : i32 to vector<8x128xi32>
    %13 = arith.addi %12, %11 : vector<8x128xi32>
    %c16_i32 = arith.constant 16 : i32
    %14 = vector.broadcast %c16_i32 : i32 to vector<8x128xi32>
    %15 = arith.shrui %13, %14 : vector<8x128xi32>
    %16 = arith.xori %13, %15 : vector<8x128xi32>
    %c-2048144789_i32 = arith.constant -2048144789 : i32
    %17 = vector.broadcast %c-2048144789_i32 : i32 to vector<8x128xi32>
    %18 = arith.muli %16, %17 : vector<8x128xi32>
    %c13_i32 = arith.constant 13 : i32
    %19 = vector.broadcast %c13_i32 : i32 to vector<8x128xi32>
    %20 = arith.shrui %18, %19 : vector<8x128xi32>
    %21 = arith.xori %18, %20 : vector<8x128xi32>
    %c-1028477387_i32 = arith.constant -1028477387 : i32
    %22 = vector.broadcast %c-1028477387_i32 : i32 to vector<8x128xi32>
    %23 = arith.muli %21, %22 : vector<8x128xi32>
    %c16_i32_0 = arith.constant 16 : i32
    %24 = vector.broadcast %c16_i32_0 : i32 to vector<8x128xi32>
    %25 = arith.shrui %23, %24 : vector<8x128xi32>
    %26 = arith.xori %23, %25 : vector<8x128xi32>
    %c1_i32_1 = arith.constant 1 : i32
    %27 = vector.broadcast %c1_i32_1 : i32 to vector<8x128xi32>
    %28 = arith.addi %13, %27 : vector<8x128xi32>
    %c16_i32_2 = arith.constant 16 : i32
    %29 = vector.broadcast %c16_i32_2 : i32 to vector<8x128xi32>
    %30 = arith.shrui %28, %29 : vector<8x128xi32>
    %31 = arith.xori %28, %30 : vector<8x128xi32>
    %c-2048144789_i32_3 = arith.constant -2048144789 : i32
    %32 = vector.broadcast %c-2048144789_i32_3 : i32 to vector<8x128xi32>
    %33 = arith.muli %31, %32 : vector<8x128xi32>
    %c13_i32_4 = arith.constant 13 : i32
    %34 = vector.broadcast %c13_i32_4 : i32 to vector<8x128xi32>
    %35 = arith.shrui %33, %34 : vector<8x128xi32>
    %36 = arith.xori %33, %35 : vector<8x128xi32>
    %c-1028477387_i32_5 = arith.constant -1028477387 : i32
    %37 = vector.broadcast %c-1028477387_i32_5 : i32 to vector<8x128xi32>
    %38 = arith.muli %36, %37 : vector<8x128xi32>
    %c16_i32_6 = arith.constant 16 : i32
    %39 = vector.broadcast %c16_i32_6 : i32 to vector<8x128xi32>
    %40 = arith.shrui %38, %39 : vector<8x128xi32>
    %41 = arith.xori %38, %40 : vector<8x128xi32>
    %c65535_i32 = arith.constant 65535 : i32
    %42 = vector.broadcast %c65535_i32 : i32 to vector<8x128xi32>
    %43 = arith.andi %26, %42 : vector<8x128xi32>
    %c36_i32 = arith.constant 36 : i32
    %44 = vector.broadcast %c36_i32 : i32 to vector<8x128xi32>
    %45 = arith.muli %43, %44 : vector<8x128xi32>
    %c16_i32_7 = arith.constant 16 : i32
    %46 = vector.broadcast %c16_i32_7 : i32 to vector<8x128xi32>
    %47 = arith.shrui %45, %46 : vector<8x128xi32>
    %c26_i32 = arith.constant 26 : i32
    %48 = vector.broadcast %c26_i32 : i32 to vector<8x128xi32>
    %49 = arith.cmpi ult, %47, %48 : vector<8x128xi32>
    %c65_i32 = arith.constant 65 : i32
    %c22_i32 = arith.constant 22 : i32
    %50 = vector.broadcast %c65_i32 : i32 to vector<8x128xi32>
    %51 = vector.broadcast %c22_i32 : i32 to vector<8x128xi32>
    %52 = arith.select %49, %50, %51 : vector<8x128xi1>, vector<8x128xi32>
    %53 = arith.addi %47, %52 : vector<8x128xi32>
    %c16_i32_8 = arith.constant 16 : i32
    %54 = vector.broadcast %c16_i32_8 : i32 to vector<8x128xi32>
    %55 = arith.shrui %26, %54 : vector<8x128xi32>
    %c36_i32_9 = arith.constant 36 : i32
    %56 = vector.broadcast %c36_i32_9 : i32 to vector<8x128xi32>
    %57 = arith.muli %55, %56 : vector<8x128xi32>
    %c16_i32_10 = arith.constant 16 : i32
    %58 = vector.broadcast %c16_i32_10 : i32 to vector<8x128xi32>
    %59 = arith.shrui %57, %58 : vector<8x128xi32>
    %c26_i32_11 = arith.constant 26 : i32
    %60 = vector.broadcast %c26_i32_11 : i32 to vector<8x128xi32>
    %61 = arith.cmpi ult, %59, %60 : vector<8x128xi32>
    %c65_i32_12 = arith.constant 65 : i32
    %c22_i32_13 = arith.constant 22 : i32
    %62 = vector.broadcast %c65_i32_12 : i32 to vector<8x128xi32>
    %63 = vector.broadcast %c22_i32_13 : i32 to vector<8x128xi32>
    %64 = arith.select %61, %62, %63 : vector<8x128xi1>, vector<8x128xi32>
    %65 = arith.addi %59, %64 : vector<8x128xi32>
    %c65535_i32_14 = arith.constant 65535 : i32
    %66 = vector.broadcast %c65535_i32_14 : i32 to vector<8x128xi32>
    %67 = arith.andi %41, %66 : vector<8x128xi32>
    %c36_i32_15 = arith.constant 36 : i32
    %68 = vector.broadcast %c36_i32_15 : i32 to vector<8x128xi32>
    %69 = arith.muli %67, %68 : vector<8x128xi32>
    %c16_i32_16 = arith.constant 16 : i32
    %70 = vector.broadcast %c16_i32_16 : i32 to vector<8x128xi32>
    %71 = arith.shrui %69, %70 : vector<8x128xi32>
    %c26_i32_17 = arith.constant 26 : i32
    %72 = vector.broadcast %c26_i32_17 : i32 to vector<8x128xi32>
    %73 = arith.cmpi ult, %71, %72 : vector<8x128xi32>
    %c65_i32_18 = arith.constant 65 : i32
    %c22_i32_19 = arith.constant 22 : i32
    %74 = vector.broadcast %c65_i32_18 : i32 to vector<8x128xi32>
    %75 = vector.broadcast %c22_i32_19 : i32 to vector<8x128xi32>
    %76 = arith.select %73, %74, %75 : vector<8x128xi1>, vector<8x128xi32>
    %77 = arith.addi %71, %76 : vector<8x128xi32>
    %c16_i32_20 = arith.constant 16 : i32
    %78 = vector.broadcast %c16_i32_20 : i32 to vector<8x128xi32>
    %79 = arith.shrui %41, %78 : vector<8x128xi32>
    %c36_i32_21 = arith.constant 36 : i32
    %80 = vector.broadcast %c36_i32_21 : i32 to vector<8x128xi32>
    %81 = arith.muli %79, %80 : vector<8x128xi32>
    %c16_i32_22 = arith.constant 16 : i32
    %82 = vector.broadcast %c16_i32_22 : i32 to vector<8x128xi32>
    %83 = arith.shrui %81, %82 : vector<8x128xi32>
    %c26_i32_23 = arith.constant 26 : i32
    %84 = vector.broadcast %c26_i32_23 : i32 to vector<8x128xi32>
    %85 = arith.cmpi ult, %83, %84 : vector<8x128xi32>
    %c65_i32_24 = arith.constant 65 : i32
    %c22_i32_25 = arith.constant 22 : i32
    %86 = vector.broadcast %c65_i32_24 : i32 to vector<8x128xi32>
    %87 = vector.broadcast %c22_i32_25 : i32 to vector<8x128xi32>
    %88 = arith.select %85, %86, %87 : vector<8x128xi1>, vector<8x128xi32>
    %89 = arith.addi %83, %88 : vector<8x128xi32>
    %c8_i32 = arith.constant 8 : i32
    %90 = vector.broadcast %c8_i32 : i32 to vector<8x128xi32>
    %91 = arith.shli %65, %90 : vector<8x128xi32>
    %92 = arith.ori %53, %91 : vector<8x128xi32>
    %c16_i32_26 = arith.constant 16 : i32
    %93 = vector.broadcast %c16_i32_26 : i32 to vector<8x128xi32>
    %94 = arith.shli %77, %93 : vector<8x128xi32>
    %95 = arith.ori %92, %94 : vector<8x128xi32>
    %c24_i32 = arith.constant 24 : i32
    %96 = vector.broadcast %c24_i32 : i32 to vector<8x128xi32>
    %97 = arith.shli %89, %96 : vector<8x128xi32>
    %98 = arith.ori %95, %97 : vector<8x128xi32>
    %c0_27 = arith.constant 0 : index
    %c0_28 = arith.constant 0 : index
    %99 = vector.load %arg2[%c0_27, %c0_28] : memref<8x128xi32, #tpu.memory_space<vmem>>, vector<8x128xi32>
    tpu.vector_store %arg2[%c0_27, %c0_28], %98 {strides = array<i32>} : memref<8x128xi32, #tpu.memory_space<vmem>>, vector<8x128xi32>,
    return
  }
  func.func @transform_0(%arg0: i32, %arg1: memref<1xi32, #tpu.memory_space<smem>>) -> (i32, i32) {
    %c0_i32 = arith.constant 0 : i32
    %c0_i32_0 = arith.constant 0 : i32
    return %c0_i32, %arg0 : i32, i32
  }
}

</mosaic_0001>

<bundles_post_ra>
// kernel: tpu_custom_call.1
= control target key start
LH: loop header
LB: loop body
LE: loop exit
PB: predicated region body
PF: predicated region fallthrough
CT: control target
= control target key end

     0   :  { %v9_v0 = vlaneseq  ;;  %s137_s0 = inlined_call_operand.<no memory space> [shape: s32[1], index: 0, kind: input, shape index: {}]   ;;  %s138_s1 = inlined_call_operand.hbm [shape: u32[8,128], index: 1, kind: output, shape index: {}]  }
   0x1   :  { %7 = vsyncpa [#allocation5], 0  ;;  %s18_s8 = smul.u32 2654435769, %s137_s0  ;;  %v110_v37 = vmov 22   ;;  %s111_s0 = smov [#allocation4]  }
   0x2   :  { %v10_v1 = vshrl.u32 %v9_v0, 7  ;;  %v12_v2 = vand.u32 127, %v9_v0  ;;  %s76_s9 = sshll.u32 %s111_s0, 4  ;;  %s77_s9 = int_to_ptr.vmem [resolvable:$true] %s76_s9 }
   0x3   :  { %v20_v5 = vstv %s18_s8  ;;  %s86_s10 = scalar_lea.vmem %s77_s9, 128  ;;  %p91_p1 = scmp.lt.s32.totalorder %s77_s9, %s77_s9 }
   0x4   :  { %v13_v3 = vmul.u32 128, %v10_v1  ;;  %p87_p0 = scmp.ne.s32.totalorder %s77_s9, %s86_s10  ;;  %p92_p2 = scmp.lt.s32.totalorder %s86_s10, %s86_s10 }
   0x6   :  { %v14_v4 = vadd.s32 %v13_v3, %v12_v2  ;;  %p93_p3 = por %p92_p2, %p91_p1 }
   0x8   :  { %v19_v6 = vshll.u32 %v14_v4, 1  ;;  %p94_p4 = pnand %p93_p3, %p87_p0 }
   0xa   :  { %v21_v7 = vadd.s32 %v20_v5, %v19_v6 }
   0xc   :  { %v22_v8 = vshrl.u32 %v21_v7, 16  ;;  %v30_v9 = vadd.s32 1, %v21_v7 }
   0xe   :  { %v23_v10 = vxor.u32 %v22_v8, %v21_v7  ;;  %v31_v11 = vshrl.u32 %v30_v9, 16 }
  0x10   :  { %v24_v12 = vmul.u32 2246822507, %v23_v10  ;;  %v32_v13 = vxor.u32 %v31_v11, %v30_v9 }
  0x12   :  { %v25_v14 = vshrl.u32 %v24_v12, 13  ;;  %v33_v15 = vmul.u32 2246822507, %v32_v13 }
  0x14   :  { %v26_v16 = vxor.u32 %v25_v14, %v24_v12  ;;  %v34_v17 = vshrl.u32 %v33_v15, 13 }
  0x16   :  { %v27_v18 = vmul.u32 3266489909, %v26_v16  ;;  %v35_v19 = vxor.u32 %v34_v17, %v33_v15 }
  0x18   :  { %v28_v20 = vshrl.u32 %v27_v18, 16  ;;  %v36_v21 = vmul.u32 3266489909, %v35_v19 }
  0x1a   :  { %v29_v22 = vxor.u32 %v28_v20, %v27_v18  ;;  %v37_v23 = vshrl.u32 %v36_v21, 16 }
  0x1c   :  { %v38_v24 = vxor.u32 %v37_v23, %v36_v21  ;;  %v39_v25 = vand.u32 65535, %v29_v22  ;;  %v45_v26 = vshrl.u32 %v29_v22, 16 }
  0x1e   :  { %v40_v27 = vmul.u32 36, %v39_v25  ;;  %v46_v28 = vmul.u32 36, %v45_v26  ;;  %v51_v29 = vand.u32 65535, %v38_v24  ;;  %v57_v30 = vshrl.u32 %v38_v24, 16 }
  0x20   :  { %v41_v31 = vshrl.u32 %v40_v27, 16  ;;  %v47_v32 = vshrl.u32 %v46_v28, 16  ;;  %v52_v33 = vmul.u32 36, %v51_v29  ;;  %v58_v34 = vmul.u32 36, %v57_v30 }
  0x22   :  { %vm42_vm0 = vcmp.lt.u32.totalorder %v41_v31, 26  ;;  %vm48_vm1 = vcmp.lt.u32.totalorder %v47_v32, 26  ;;  %v53_v35 = vshrl.u32 %v52_v33, 16  ;;  %v59_v36 = vshrl.u32 %v58_v34, 16 }
  0x23   :  { %v43_v38 = vsel %vm42_vm0, 65, %v110_v37  ;;  %v49_v39 = vsel %vm48_vm1, 65, %v110_v37 }
  0x24   :  { %v44_v40 = vadd.s32 %v43_v38, %v41_v31  ;;  %v50_v41 = vadd.s32 %v49_v39, %v47_v32  ;;  %vm54_vm2 = vcmp.lt.u32.totalorder %v53_v35, 26  ;;  %vm60_vm3 = vcmp.lt.u32.totalorder %v59_v36, 26 }
  0x25   :  { %v55_v42 = vsel %vm54_vm2, 65, %v110_v37  ;;  %v61_v43 = vsel %vm60_vm3, 65, %v110_v37 }
  0x26   :  { %v56_v44 = vadd.s32 %v55_v42, %v53_v35  ;;  %v62_v45 = vadd.s32 %v61_v43, %v59_v36  ;;  %v63_v46 = vshll.u32 %v50_v41, 8 }
  0x28   :  { %v64_v47 = vor.u32 %v63_v46, %v44_v40  ;;  %v65_v48 = vshll.u32 %v56_v44, 16  ;;  %v67_v49 = vshll.u32 %v62_v45, 24 }
  0x2a   :  { %v66_v50 = vor.u32 %v65_v48, %v64_v47 }
  0x2c   :  { %v68_v51 = vor.u32 %v67_v49, %v66_v50 }
  0x2e   :  { %69 = vst [vmem:[#allocation4] sm:$0xff] %v68_v51 }
  0x2f   :  { %97 = shalt.err (!%p94_p4)
}
  0x30   :  { %s98_s13 = scalar_lea.hbm %s138_s1, 128 }
  0x31   :  { %p99_p5 = scmp.ne.s32.totalorder %s138_s1, %s98_s13  ;;  %p102_p6 = scmp.lt.u32.totalorder %s98_s13, %s138_s1 }
  0x33   :  { %p104_p7 = pnand %p102_p6, %p99_p5 }
  0x35   :  { %107 = shalt.err (!%p104_p7)
}
  0x36   :  { %79 = dma.vmem_to_hbm [thread:$0]  %s77_s9, 128, %s138_s1, [#allocation5]  }
  0x37   :  { %108 = dma.done.wait [#allocation5], 128  }
  0x38   :  { %109 = vsyncadd [#allocation5], 4294967168 }
  0x39   :  { %83 = vsyncpa [#allocation5], 1 }

</bundles_post_ra>
